<compile_context>
chip_gen: v7x
topology: tpu7x:2x2x1
jax: 0.10.0
libtpu: 0.0.40
codegen_flags: <defaults>
</compile_context>

<pallas_src>
import jax
import jax.numpy as jnp
from jax.experimental import pallas as pl
from jax.experimental.pallas import tpu as pltpu

LANES = 128


def _recall_ce_kernel(pw_ref, d_ref, t_ref, num_ref, den_ref, num_acc, den_acc):
    # pw_ref          : (1,)       f32 SMEM scalar: positive-class weight
    # d_ref           : (bs, 128)  logit delta l1 - l0 (producer dtype)
    # t_ref           : (bs, 128)  int8 targets (0 / 1 / 2, 2 == padding)
    # num_ref/den_ref : (1, 8, 128) f32 per-core partial sums
    # num_acc/den_acc : (bs, 128)  f32 VMEM scratch accumulators (per core)
    i = pl.program_id(1)

    @pl.when(i == 0)
    def _init():
        num_acc[...] = jnp.zeros_like(num_acc)
        den_acc[...] = jnp.zeros_like(den_acc)

    pos_w = pw_ref[0]
    delta = d_ref[...].astype(jnp.float32)          # l1 - l0
    t = t_ref[...].astype(jnp.int32)                # unpack i8 -> i32 layout

    is_pos = t == 1
    d = jnp.where(is_pos, -delta, delta)            # l_other - l_target
    # nll = logsumexp(l) - l_target == softplus(d), numerically stable form.
    # (jnp.log(1+x) kept over log1p for guaranteed Mosaic lowering; the
    #  accuracy difference is far below the 1e-5 tolerance in f32.)
    nll = jnp.maximum(d, 0.0) + jnp.log(1.0 + jnp.exp(-jnp.abs(d)))
    # class weight doubles as the padding mask: sentinel targets get w == 0
    w = jnp.where(is_pos, pos_w, jnp.where(t == 0, 1.0, 0.0))

    # elementwise (VPU) accumulation; cross-sublane reduce happens once per core
    num_acc[...] += w * nll
    den_acc[...] += w

    @pl.when(i == pl.num_programs(1) - 1)
    def _finalize():
        bs = num_acc.shape[0]
        num_ref[...] = jnp.sum(num_acc[...].reshape(bs // 8, 8, LANES),
                               axis=0, keepdims=True)
        den_ref[...] = jnp.sum(den_acc[...].reshape(bs // 8, 8, LANES),
                               axis=0, keepdims=True)


def recall_ce_loss(logits, targets, pos_w, block_rows=2048, num_cores=2):
    """logits: (N, 2) float, targets: (N,) int class indices -> scalar f32 loss.

    Matches torch.nn.CrossEntropyLoss(weight=[1.0, pos_w]) ('mean' reduction).
    """
    n, c = logits.shape
    assert c == 2, "RecallCELoss kernel expects binary logits (N, 2)"

    sub = 32                                               # int8 sublane tiling
    rows = -(-n // LANES)                                  # ceil(N / 128)
    bs = min(int(block_rows), -(-rows // sub) * sub)
    bs = max(sub, (bs // sub) * sub)                       # multiple of 32
    chunks = -(-rows // bs)
    cpc = -(-chunks // num_cores)                          # chunks per core
    rows_padded = cpc * num_cores * bs
    pad = rows_padded * LANES - n

    # Single lane-dense delta plane (producer dtype) + int8 sentinel targets.
    # Under jit this pre-pass fuses into one cheap XLA op per array.
    delta = jnp.pad(logits[:, 1] - logits[:, 0], (0, pad))
    delta = delta.reshape(rows_padded, LANES)
    t = jnp.pad(targets.astype(jnp.int8), (0, pad), constant_values=2)
    t = t.reshape(rows_padded, LANES)
    pw = jnp.asarray(pos_w, dtype=jnp.float32).reshape((1,))

    num_out, den_out = pl.pallas_call(
        _recall_ce_kernel,
        out_shape=(
            jax.ShapeDtypeStruct((num_cores, 8, LANES), jnp.float32),
            jax.ShapeDtypeStruct((num_cores, 8, LANES), jnp.float32),
        ),
        grid_spec=pltpu.PrefetchScalarGridSpec(
            num_scalar_prefetch=0,
            grid=(num_cores, cpc),
            in_specs=[
                pl.BlockSpec(memory_space=pltpu.MemorySpace.SMEM),       # pos_w
                pl.BlockSpec((bs, LANES), lambda c_, i: (c_ * cpc + i, 0)),  # delta
                pl.BlockSpec((bs, LANES), lambda c_, i: (c_ * cpc + i, 0)),  # targets
            ],
            out_specs=[
                pl.BlockSpec((1, 8, LANES), lambda c_, i: (c_, 0, 0)),   # num
                pl.BlockSpec((1, 8, LANES), lambda c_, i: (c_, 0, 0)),   # den
            ],
            scratch_shapes=[
                pltpu.VMEM((bs, LANES), jnp.float32),    # weighted-nll accumulator
                pltpu.VMEM((bs, LANES), jnp.float32),    # weight accumulator
            ],
        ),
        compiler_params=pltpu.CompilerParams(
            dimension_semantics=("parallel", "arbitrary")),
    )(pw, delta, t)

    return jnp.sum(num_out) / jnp.sum(den_out)


def _reference_ce(logits, targets, pos_w):
    # pure-JAX reference matching torch.nn.CrossEntropyLoss(weight=[1, pos_w])
    w = jnp.array([1.0, pos_w], dtype=jnp.float32)
    logp = jax.nn.log_softmax(logits.astype(jnp.float32), axis=-1)
    nll = -jnp.take_along_axis(logp, targets[:, None], axis=-1)[:, 0]
    wt = w[targets]
    return jnp.sum(wt * nll) / jnp.sum(wt)


if __name__ == "__main__":
    key = jax.random.PRNGKey(0)
    k1, k2 = jax.random.split(key)

    N, C = 9000, 2        # binary collision / no-collision classification
    pos_w = 3.0           # positive-class weight

    logits = jax.random.normal(k1, (N, C), dtype=jnp.float32)
    targets = jax.random.randint(k2, (N,), 0, C, dtype=jnp.int32)

    loss_fn = jax.jit(recall_ce_loss, static_argnames=("block_rows", "num_cores"))

    # multi-chunk path: rows=71 -> bs=32 -> 2 chunks per core, sentinel padding
    loss_tiled = jax.block_until_ready(
        loss_fn(logits, targets, pos_w, block_rows=32))
    # default tiling: one (clamped) block per core
    loss_default = jax.block_until_ready(loss_fn(logits, targets, pos_w))

    ref = jax.block_until_ready(_reference_ce(logits, targets, pos_w))
    assert jnp.allclose(loss_tiled, ref, atol=1e-5, rtol=1e-5), (loss_tiled, ref)
    assert jnp.allclose(loss_default, ref, atol=1e-5, rtol=1e-5), (loss_default, ref)

    print("KERNEL_OK")
</pallas_src>

<mosaic_0001>
module attributes {stable_mosaic.version = 11 : i64} {
  func.func @_recall_ce_kernel(%arg0: i32, %arg1: i32, %arg2: memref<1xf32, #tpu.memory_space<smem>>, %arg3: memref<32x128xf32, #tpu.memory_space<vmem>>, %arg4: memref<32x128xi8, #tpu.memory_space<vmem>>, %arg5: memref<1x8x128xf32, #tpu.memory_space<vmem>>, %arg6: memref<1x8x128xf32, #tpu.memory_space<vmem>>, %arg7: memref<32x128xf32, #tpu.memory_space<vmem>>, %arg8: memref<32x128xf32, #tpu.memory_space<vmem>>) attributes {dimension_semantics = [#tpu.dimension_semantics<parallel>, #tpu.dimension_semantics<arbitrary>], iteration_bounds = array<i64: 2, 2>, scalar_prefetch = 0 : i64, scratch_operands = 2 : i64, tpu.core_type = #tpu.core_type<tc>, window_params = [{transform_indices = @transform_0, window_bounds = array<i64: 1>}, {transform_indices = @transform_1, window_bounds = array<i64: 32, 128>}, {transform_indices = @transform_2, window_bounds = array<i64: 32, 128>}, {transform_indices = @transform_3, window_bounds = array<i64: 1, 8, 128>}, {transform_indices = @transform_4, window_bounds = array<i64: 1, 8, 128>}]} {
    %c0_i32 = arith.constant 0 : i32
    %0 = arith.cmpi eq, %arg1, %c0_i32 : i32
    %1 = arith.extui %0 : i1 to i32
    %c0_i32_0 = arith.constant 0 : i32
    %2 = arith.cmpi ne, %1, %c0_i32_0 : i32
    scf.if %2 {
      %cst_21 = arith.constant 0.000000e+00 : f32
      %39 = vector.broadcast %cst_21 : f32 to vector<32x128xf32>
      %c0_22 = arith.constant 0 : index
      %c0_23 = arith.constant 0 : index
      %40 = vector.load %arg7[%c0_22, %c0_23] : memref<32x128xf32, #tpu.memory_space<vmem>>, vector<32x128xf32>
      tpu.vector_store %arg7[%c0_22, %c0_23], %39 {strides = array<i32>} : memref<32x128xf32, #tpu.memory_space<vmem>>, vector<32x128xf32>,
      %cst_24 = arith.constant 0.000000e+00 : f32
      %41 = vector.broadcast %cst_24 : f32 to vector<32x128xf32>
      %c0_25 = arith.constant 0 : index
      %c0_26 = arith.constant 0 : index
      %42 = vector.load %arg8[%c0_25, %c0_26] : memref<32x128xf32, #tpu.memory_space<vmem>>, vector<32x128xf32>
      tpu.vector_store %arg8[%c0_25, %c0_26], %41 {strides = array<i32>} : memref<32x128xf32, #tpu.memory_space<vmem>>, vector<32x128xf32>,
    } else {
    }
    %c0 = arith.constant 0 : index
    %3 = memref.load %arg2[%c0] : memref<1xf32, #tpu.memory_space<smem>>
    %c0_1 = arith.constant 0 : index
    %c0_2 = arith.constant 0 : index
    %4 = vector.load %arg3[%c0_1, %c0_2] : memref<32x128xf32, #tpu.memory_space<vmem>>, vector<32x128xf32>
    %c0_3 = arith.constant 0 : index
    %c0_4 = arith.constant 0 : index
    %5 = vector.load %arg4[%c0_3, %c0_4] : memref<32x128xi8, #tpu.memory_space<vmem>>, vector<32x128xi8>
    %6 = arith.extsi %5 : vector<32x128xi8> to vector<32x128xi32>
    %c1_i32 = arith.constant 1 : i32
    %7 = vector.broadcast %c1_i32 : i32 to vector<32x128xi32>
    %8 = arith.cmpi eq, %6, %7 : vector<32x128xi32>
    %cst = arith.constant 0.000000e+00 : f32
    %9 = vector.broadcast %cst : f32 to vector<32x128xf32>
    %10 = arith.subf %9, %4 : vector<32x128xf32>
    %11 = arith.select %8, %10, %4 : vector<32x128xi1>, vector<32x128xf32>
    %cst_5 = arith.constant 0.000000e+00 : f32
    %12 = vector.broadcast %cst_5 : f32 to vector<32x128xf32>
    %13 = arith.maximumf %11, %12 : vector<32x128xf32>
    %14 = math.absf %11 : vector<32x128xf32>
    %cst_6 = arith.constant 0.000000e+00 : f32
    %15 = vector.broadcast %cst_6 : f32 to vector<32x128xf32>
    %16 = arith.subf %15, %14 : vector<32x128xf32>
    %17 = math.exp %16 : vector<32x128xf32>
    %cst_7 = arith.constant 1.000000e+00 : f32
    %18 = vector.broadcast %cst_7 : f32 to vector<32x128xf32>
    %19 = arith.addf %18, %17 : vector<32x128xf32>
    %20 = math.log %19 : vector<32x128xf32>
    %21 = arith.addf %13, %20 : vector<32x128xf32>
    %c0_i32_8 = arith.constant 0 : i32
    %22 = vector.broadcast %c0_i32_8 : i32 to vector<32x128xi32>
    %23 = arith.cmpi eq, %6, %22 : vector<32x128xi32>
    %cst_9 = arith.constant 1.000000e+00 : f32
    %cst_10 = arith.constant 0.000000e+00 : f32
    %24 = vector.broadcast %cst_9 : f32 to vector<32x128xf32>
    %25 = vector.broadcast %cst_10 : f32 to vector<32x128xf32>
    %26 = arith.select %23, %24, %25 : vector<32x128xi1>, vector<32x128xf32>
    %27 = vector.broadcast %3 : f32 to vector<32x128xf32>
    %28 = arith.select %8, %27, %26 : vector<32x128xi1>, vector<32x128xf32>
    %c0_11 = arith.constant 0 : index
    %c0_12 = arith.constant 0 : index
    %29 = vector.load %arg7[%c0_11, %c0_12] : memref<32x128xf32, #tpu.memory_space<vmem>>, vector<32x128xf32>
    %30 = arith.mulf %28, %21 : vector<32x128xf32>
    %31 = arith.addf %29, %30 : vector<32x128xf32>
    %c0_13 = arith.constant 0 : index
    %c0_14 = arith.constant 0 : index
    %32 = vector.load %arg7[%c0_13, %c0_14] : memref<32x128xf32, #tpu.memory_space<vmem>>, vector<32x128xf32>
    tpu.vector_store %arg7[%c0_13, %c0_14], %31 {strides = array<i32>} : memref<32x128xf32, #tpu.memory_space<vmem>>, vector<32x128xf32>,
    %c0_15 = arith.constant 0 : index
    %c0_16 = arith.constant 0 : index
    %33 = vector.load %arg8[%c0_15, %c0_16] : memref<32x128xf32, #tpu.memory_space<vmem>>, vector<32x128xf32>
    %34 = arith.addf %33, %28 : vector<32x128xf32>
    %c0_17 = arith.constant 0 : index
    %c0_18 = arith.constant 0 : index
    %35 = vector.load %arg8[%c0_17, %c0_18] : memref<32x128xf32, #tpu.memory_space<vmem>>, vector<32x128xf32>
    tpu.vector_store %arg8[%c0_17, %c0_18], %34 {strides = array<i32>} : memref<32x128xf32, #tpu.memory_space<vmem>>, vector<32x128xf32>,
    %c1_i32_19 = arith.constant 1 : i32
    %36 = arith.cmpi eq, %arg1, %c1_i32_19 : i32
    %37 = arith.extui %36 : i1 to i32
    %c0_i32_20 = arith.constant 0 : i32
    %38 = arith.cmpi ne, %37, %c0_i32_20 : i32
    scf.if %38 {
      %c0_21 = arith.constant 0 : index
      %c0_22 = arith.constant 0 : index
      %39 = vector.load %arg7[%c0_21, %c0_22] : memref<32x128xf32, #tpu.memory_space<vmem>>, vector<32x128xf32>
      %40 = vector.shape_cast %39 : vector<32x128xf32> to vector<4x8x128xf32>
      %cst_23 = arith.constant dense<0.000000e+00> : vector<8x128xf32>
      %41 = vector.multi_reduction <add>, %40, %cst_23 [0] : vector<4x8x128xf32> to vector<8x128xf32>
      %42 = vector.shape_cast %41 : vector<8x128xf32> to vector<1x8x128xf32>
      %c0_24 = arith.constant 0 : index
      %c0_25 = arith.constant 0 : index
      %c0_26 = arith.constant 0 : index
      %43 = vector.load %arg5[%c0_24, %c0_25, %c0_26] : memref<1x8x128xf32, #tpu.memory_space<vmem>>, vector<1x8x128xf32>
      tpu.vector_store %arg5[%c0_24, %c0_25, %c0_26], %42 {strides = array<i32>} : memref<1x8x128xf32, #tpu.memory_space<vmem>>, vector<1x8x128xf32>,
      %c0_27 = arith.constant 0 : index
      %c0_28 = arith.constant 0 : index
      %44 = vector.load %arg8[%c0_27, %c0_28] : memref<32x128xf32, #tpu.memory_space<vmem>>, vector<32x128xf32>
      %45 = vector.shape_cast %44 : vector<32x128xf32> to vector<4x8x128xf32>
      %cst_29 = arith.constant dense<0.000000e+00> : vector<8x128xf32>
      %46 = vector.multi_reduction <add>, %45, %cst_29 [0] : vector<4x8x128xf32> to vector<8x128xf32>
      %47 = vector.shape_cast %46 : vector<8x128xf32> to vector<1x8x128xf32>
      %c0_30 = arith.constant 0 : index
      %c0_31 = arith.constant 0 : index
      %c0_32 = arith.constant 0 : index
      %48 = vector.load %arg6[%c0_30, %c0_31, %c0_32] : memref<1x8x128xf32, #tpu.memory_space<vmem>>, vector<1x8x128xf32>
      tpu.vector_store %arg6[%c0_30, %c0_31, %c0_32], %47 {strides = array<i32>} : memref<1x8x128xf32, #tpu.memory_space<vmem>>, vector<1x8x128xf32>,
    } else {
    }
    return
  }
  func.func @transform_0(%arg0: i32, %arg1: i32) -> i32 {
    %c0_i32 = arith.constant 0 : i32
    %c0_i32_0 = arith.constant 0 : i32
    return %c0_i32 : i32
  }
  func.func @transform_1(%arg0: i32, %arg1: i32) -> (i32, i32) {
    %c2_i32 = arith.constant 2 : i32
    %0 = arith.muli %arg0, %c2_i32 : i32
    %1 = arith.addi %0, %arg1 : i32
    %c0_i32 = arith.constant 0 : i32
    %c0_i32_0 = arith.constant 0 : i32
    return %1, %c0_i32 : i32, i32
  }
  func.func @transform_2(%arg0: i32, %arg1: i32) -> (i32, i32) {
    %c2_i32 = arith.constant 2 : i32
    %0 = arith.muli %arg0, %c2_i32 : i32
    %1 = arith.addi %0, %arg1 : i32
    %c0_i32 = arith.constant 0 : i32
    %c0_i32_0 = arith.constant 0 : i32
    return %1, %c0_i32 : i32, i32
  }
  func.func @transform_3(%arg0: i32, %arg1: i32) -> (i32, i32, i32) {
    %c0_i32 = arith.constant 0 : i32
    %c0_i32_0 = arith.constant 0 : i32
    %c0_i32_1 = arith.constant 0 : i32
    return %arg0, %c0_i32, %c0_i32_0 : i32, i32, i32
  }
  func.func @transform_4(%arg0: i32, %arg1: i32) -> (i32, i32, i32) {
    %c0_i32 = arith.constant 0 : i32
    %c0_i32_0 = arith.constant 0 : i32
    %c0_i32_1 = arith.constant 0 : i32
    return %arg0, %c0_i32, %c0_i32_0 : i32, i32, i32
  }
}

</mosaic_0001>

<bundles_post_ra>
// kernel: recall_ce_loss.1
= control target key start
LH: loop header
LB: loop body
LE: loop exit
PB: predicated region body
PF: predicated region fallthrough
CT: control target
= control target key end

     0   :  { %s653_s17 = smov 0   ;;  %s655_s18 = smov 0   ;;  %s771_s0 = inlined_call_operand.<no memory space> [shape: f32[1], index: 0, kind: input, shape index: {}]   ;;  %s772_s1 = inlined_call_operand.vmem [shape: f32[128,128], index: 1, kind: input, shape index: {}]   ;;  %s773_s2 = inlined_call_operand.vmem [shape: s8[128,128], index: 2, kind: input, shape index: {}]   ;;  %s774_s3 = inlined_call_operand.vmem [shape: f32[2,8,128], index: 3, kind: output, shape index: {0}]   ;;  %s775_s4 = inlined_call_operand.vmem [shape: f32[2,8,128], index: 4, kind: output, shape index: {1}]  }
   0x1   :  { %10 = sst [smem:[#allocation4]] %s771_s0  ;;  %s657_s19 = smov 0  }
   0x2   :  { %s659_s20 = smov 0   ;;  %s661_s21 = smov 0  }
   0x3 LB: > { %s25_s0 = sadd.s32 1, %s613_s19  ;;  %s28_s22 = sadd.s32 1, %s617_s20  ;;  %s621_s21 = sphi %s661_s21, %s16_s21   ;;  %s617_s20 = sphi %s659_s20, %s787_s20   ;;  %s613_s19 = sphi %s657_s19, %s786_s19   ;;  %s609_s18 = sphi %s655_s18, %s785_s18   ;;  %s605_s17 = sphi %s653_s17, %s784_s17  }
   0x4   : > { %p26_p0 = scmp.ge.s32.totalorder %s25_s0, 2  ;;  %p513_p1 = scmp.ge.s32.totalorder %s621_s21, 1 }
   0x5   : > { %p204_p2 = scmp.lt.s32.totalorder %s621_s21, 5 }
   0x6   : > { %s789_s0 = smov (%p26_p0, %s25_s0), 0  ;;  %s791_s22 = smov (!%p26_p0, %s28_s22), %s617_s20 }
   0x7   : > { %p205_p3 = pnand %p513_p1, %p204_p2  ;;  %p30_p4 = scmp.ge.s32.totalorder %s791_s22, 2 }
   0x8   : > { %s514_s23 = sshll.u32 (!%p205_p3), %s609_s18, 1  ;;  %p259_p7 = scmp.lt.s32.totalorder (!%p205_p3), %s609_s18, 1 }
   0x9   : > { %s793_s22 = smov (%p30_p4, %s791_s22), 0  ;;  %208 = sbr.rel (%p205_p3) target bundleno = 86 (0x56), region = 32 }
   0xa   : > { %s242_s24 = sadd.s32 (!%p205_p3), %s605_s17, %s514_s23  ;;  %p521_p8 = scmp.ne.s32.totalorder (!%p205_p3), %s605_s17, 0 }
   0xb   : > { %s515_s25 = sshll.u32 (!%p205_p3), %s242_s24, 2  ;;  %p253_p5 = scmp.lt.s32.totalorder (!%p205_p3), %s242_s24, 3 }
   0xc   : > { %p244_p6 = scmp.lt.s32.totalorder (!%p205_p3), %s515_s25, 15 }
  0x10   : > { %s795_s24 = smov (!%p253_p5, %s242_s24), 3  ;;  %s797_s25 = smov (!%p244_p6, %s515_s25), 15 }
  0x11   : > { %s518_s26 = sshll.u32 %s795_s24, 3  ;;  %s516_s27 = sshll.u32 %s797_s25, 3  ;;  %v623_v0 = vmov (!%p521_p8), 0.0  }
  0x12   : > { %s256_s30 = scalar_lea.vmem %s773_s2, %s518_s26  ;;  %s692_s7 = scalar_lea.vmem %s772_s1, %s516_s27  ;;  %271 = vst [vmem:[#allocation2] sm:$0xff] (!%p521_p8), %v623_v0  ;;  %272 = vst [vmem:[#allocation2 + $0x8] sm:$0xff] (!%p521_p8), %v623_v0 }
  0x13   : > { %s799_s18 = smov (!%p259_p7, %s609_s18), 1  ;;  %270 = sbr.rel (%p521_p8) target bundleno = 26 (0x1a), region = 36 }
  0x14   : > { %s519_s8 = sshll.u32 %s799_s18, 3  ;;  %273 = vst [vmem:[#allocation2 + $0x10] sm:$0xff] (!%p521_p8), %v623_v0  ;;  %274 = vst [vmem:[#allocation2 + $0x18] sm:$0xff] (!%p521_p8), %v623_v0 }
  0x15   : > { %s697_s11 = scalar_lea.vmem %s774_s3, %s519_s8  ;;  %s702_s14 = scalar_lea.vmem %s775_s4, %s519_s8  ;;  %275 = vst [vmem:[#allocation3] sm:$0xff] (!%p521_p8), %v623_v0  ;;  %276 = vst [vmem:[#allocation3 + $0x8] sm:$0xff] (!%p521_p8), %v623_v0 }
  0x16   : > { %277 = vst [vmem:[#allocation3 + $0x10] sm:$0xff] (!%p521_p8), %v623_v0  ;;  %278 = vst [vmem:[#allocation3 + $0x18] sm:$0xff] (!%p521_p8), %v623_v0 }
  0x1a PF: > { %s279_s15 = sld [smem:[#allocation4]]  ;;  %v280_v1 = vld [vmem:[%s692_s7] sm:$0xff]  ;;  %v281_v5 = vld [vmem:[%s692_s7 + $0x8] sm:$0xff]  ;;  %v282_v7 = vld [vmem:[%s692_s7 + $0x10] sm:$0xff]  ;;  %v624_v17 = vmov 0.0   ;;  %p522_p9 = scmp.ne.s32.totalorder %s605_s17, 1 }
  0x1b   : > { %v284_v2 = vld [vmem:[%s256_s30] sm:$0xff]  ;;  %v293_v4 = vsub.f32 0.0, %v280_v1  ;;  %v294_v8 = vsub.f32 0.0, %v281_v5  ;;  %v295_v15 = vsub.f32 0.0, %v282_v7  ;;  %v283_v20 = vld [vmem:[%s692_s7 + $0x18] sm:$0xff] }
  0x1c   : > { %v285_v3 = vunpack.c.0.s8 %v284_v2  ;;  %v286_v6 = vunpack.c.1.s8 %v284_v2  ;;  %v287_v9 = vunpack.c.2.s8 %v284_v2  ;;  %v288_v10 = vunpack.c.3.s8 %v284_v2  ;;  %v366_v27 = vld [vmem:[#allocation3] sm:$0xff]  ;;  %v367_v35 = vld [vmem:[#allocation3 + $0x8] sm:$0xff] }
  0x1d   : > { %v296_v30 = vsub.f32 0.0, %v283_v20  ;;  %v368_v36 = vld [vmem:[#allocation3 + $0x10] sm:$0xff]  ;;  %v369_v41 = vld [vmem:[#allocation3 + $0x18] sm:$0xff] }
  0x1e   : > { %vm708_vm0 = vcmp.eq.s32.totalorder %v285_v3, 1  ;;  %vm337_vm1 = vcmp.eq.s32.totalorder %v285_v3, 0  ;;  %vm712_vm2 = vcmp.eq.s32.totalorder %v286_v6, 1  ;;  %vm338_vm3 = vcmp.eq.s32.totalorder %v286_v6, 0  ;;  %v350_v3 = vld [vmem:[#allocation2] sm:$0xff] }
  0x1f   : > { %v718_v13 = vsel %vm708_vm0, %v293_v4, %v280_v1  ;;  %v722_v14 = vsel %vm712_vm2, %v294_v8, %v281_v5  ;;  %v341_v18 = vsel %vm337_vm1, 1.0, %v624_v17  ;;  %v342_v22 = vsel %vm338_vm3, 1.0, %v624_v17  ;;  %v351_v8 = vld [vmem:[#allocation2 + $0x8] sm:$0xff] }
  0x20   : > { %v305_v16 = vand.u32 2147483647, %v718_v13  ;;  %v306_v19 = vand.u32 2147483647, %v722_v14  ;;  %v345_v21 = vstv %s279_s15  ;;  %vm727_vm4 = vcmp.eq.s32.totalorder %v287_v9, 1 }
  0x21   : > { %vm339_vm5 = vcmp.eq.s32.totalorder %v287_v9, 0  ;;  %vm731_vm6 = vcmp.eq.s32.totalorder %v288_v10, 1  ;;  %v737_v28 = vsel %vm727_vm4, %v295_v15, %v282_v7  ;;  %vm340_vm7 = vcmp.eq.s32.totalorder %v288_v10, 0 }
  0x22   : > { %v309_v24 = vsub.f32 0.0, %v305_v16  ;;  %v310_v25 = vsub.f32 0.0, %v306_v19  ;;  %v343_v29 = vsel %vm339_vm5, 1.0, %v624_v17  ;;  %v346_v32 = vsel %vm708_vm0, %v345_v21, %v341_v18 }
  0x23   : > { %v347_v34 = vsel %vm712_vm2, %v345_v21, %v342_v22  ;;  %v307_v37 = vand.u32 2147483647, %v737_v28  ;;  %v300_v38 = vsel %vm731_vm6, %v296_v30, %v283_v20  ;;  %v344_v39 = vsel %vm340_vm7, 1.0, %v624_v17  ;;  %v353_v20 = vld [vmem:[#allocation2 + $0x18] sm:$0xff] }
  0x24   : > { %v313_v31 = vmul.f32 1.442695, %v309_v24  ;;  %v315_v33 = vmul.f32 1.442695, %v310_v25  ;;  %v370_v40 = vadd.f32 %v366_v27, %v346_v32  ;;  %v348_v42 = vsel %vm727_vm4, %v345_v21, %v343_v29 }
  0x25   : > { %v308_v43 = vand.u32 2147483647, %v300_v38  ;;  %v349_v44 = vsel %vm731_vm6, %v345_v21, %v344_v39  ;;  %v311_v45 = vsub.f32 0.0, %v307_v37  ;;  %v371_v46 = vadd.f32 %v367_v35, %v347_v34 }
  0x26   : > { %567 = vpow2.f32 %v313_v31  ;;  %374 = vst [vmem:[#allocation3] sm:$0xff] %v370_v40  ;;  %v372_v47 = vadd.f32 %v368_v36, %v348_v42  ;;  %v373_v49 = vadd.f32 %v369_v41, %v349_v44  ;;  %v301_v60 = vmax.f32 %v718_v13, 0.0 }
  0x27   : > { %569 = vpow2.f32 %v315_v33  ;;  %v312_v48 = vsub.f32 0.0, %v308_v43  ;;  %v317_v50 = vmul.f32 1.442695, %v311_v45  ;;  %375 = vst [vmem:[#allocation3 + $0x8] sm:$0xff] %v371_v46  ;;  %v302_v62 = vmax.f32 %v722_v14, 0.0  ;;  %v352_v14 = vld [vmem:[#allocation2 + $0x10] sm:$0xff] }
  0x28   : > { %376 = vst [vmem:[#allocation3 + $0x10] sm:$0xff] %v372_v47  ;;  %377 = vst [vmem:[#allocation3 + $0x18] sm:$0xff] %v373_v49  ;;  %v303_v5 = vmax.f32 %v737_v28, 0.0  ;;  %v304_v9 = vmax.f32 %v300_v38, 0.0 }
  0x29   : > { %v319_v51 = vmul.f32 1.442695, %v312_v48  ;;  %571 = vpow2.f32 %v317_v50 }
  0x2b   : > { %573 = vpow2.f32 %v319_v51 }
  0x2d   : > { %v390_v28 = vld [vmem:[#allocation3] sm:$0xff] (!%p522_p9) }
  0x2e   : > { %v391_v29 = vld [vmem:[#allocation3 + $0x8] sm:$0xff] (!%p522_p9) }
  0x2f   : > { %v392_v31 = vld [vmem:[#allocation3 + $0x10] sm:$0xff] (!%p522_p9) }
  0x30   : > { %v568_v52 = vpop.eup %567 }
  0x31   : > { %v570_v53 = vpop.eup %569  ;;  %v321_v54 = vadd.f32 1.0, %v568_v52 }
  0x32   : > { %v322_v55 = vadd.f32 1.0, %v570_v53 }
  0x33   : > { %575 = vlog2.f32 %v321_v54  ;;  %v572_v56 = vpop.eup %571 }
  0x34   : > { %577 = vlog2.f32 %v322_v55  ;;  %v323_v58 = vadd.f32 1.0, %v572_v56 }
  0x35   : > { %v574_v57 = vpop.eup %573 }
  0x36   : > { %v324_v59 = vadd.f32 1.0, %v574_v57  ;;  %579 = vlog2.f32 %v323_v58 }
  0x38   : > { %581 = vlog2.f32 %v324_v59 }
  0x3d   : > { %v576_v61 = vpop.eup %575 }
  0x3e   : > { %v578_v63 = vpop.eup %577  ;;  %v326_v0 = vmul.f32 0.6931472, %v576_v61 }
  0x3f   : > { %v328_v1 = vmul.f32 0.6931472, %v578_v63 }
  0x40   : > { %v333_v2 = vadd.f32 %v326_v0, %v301_v60  ;;  %v580_v6 = vpop.eup %579 }
  0x41   : > { %v334_v4 = vadd.f32 %v328_v1, %v302_v62  ;;  %v330_v12 = vmul.f32 0.6931472, %v580_v6 }
  0x42   : > { %v354_v7 = vmul.f32 %v346_v32, %v333_v2  ;;  %v582_v10 = vpop.eup %581  ;;  %v394_v32 = vadd.f32 (!%p522_p9), %v391_v29, %v390_v28 }
  0x43   : > { %v355_v11 = vmul.f32 %v347_v34, %v334_v4  ;;  %v332_v13 = vmul.f32 0.6931472, %v582_v10  ;;  %v335_v17 = vadd.f32 %v330_v12, %v303_v5  ;;  %v393_v34 = vld [vmem:[#allocation3 + $0x18] sm:$0xff] (!%p522_p9) }
  0x44   : > { %v358_v15 = vadd.f32 %v354_v7, %v350_v3  ;;  %v395_v35 = vadd.f32 (!%p522_p9), %v394_v32, %v392_v31 }
  0x45   : > { %v359_v16 = vadd.f32 %v355_v11, %v351_v8  ;;  %v336_v18 = vadd.f32 %v332_v13, %v304_v9  ;;  %v356_v19 = vmul.f32 %v348_v42, %v335_v17  ;;  %381 = sbr.rel (%p522_p9) target bundleno = 86 (0x56), region = 40 }
  0x46   : > { %362 = vst [vmem:[#allocation2] sm:$0xff] %v358_v15  ;;  %v396_v37 = vadd.f32 (!%p522_p9), %v395_v35, %v393_v34 }
  0x47   : > { %363 = vst [vmem:[#allocation2 + $0x8] sm:$0xff] %v359_v16  ;;  %v357_v21 = vmul.f32 %v349_v44, %v336_v18  ;;  %v360_v22 = vadd.f32 %v356_v19, %v352_v14 }
  0x48   : > { %397 = vst [vmem:[%s702_s14] sm:$0xff] (!%p522_p9), %v396_v37 }
  0x49   : > { %v361_v23 = vadd.f32 %v357_v21, %v353_v20  ;;  %364 = vst [vmem:[#allocation2 + $0x10] sm:$0xff] %v360_v22 }
  0x4b   : > { %365 = vst [vmem:[#allocation2 + $0x18] sm:$0xff] %v361_v23 }
  0x4d   : > { %v382_v24 = vld [vmem:[#allocation2] sm:$0xff] }
  0x4e   : > { %v383_v25 = vld [vmem:[#allocation2 + $0x8] sm:$0xff] }
  0x4f   : > { %v386_v27 = vadd.f32 %v383_v25, %v382_v24 }
  0x50   : > { %v384_v26 = vld [vmem:[#allocation2 + $0x10] sm:$0xff] }
  0x51   : > { %v387_v33 = vadd.f32 %v386_v27, %v384_v26 }
  0x52   : > { %v385_v30 = vld [vmem:[#allocation2 + $0x18] sm:$0xff] }
  0x53   : > { %v388_v36 = vadd.f32 %v387_v33, %v385_v30 }
  0x55   : > { %389 = vst [vmem:[%s697_s11] sm:$0xff] %v388_v36 }
  0x56 PF: > { %s16_s21 = sadd.s32 1, %s621_s21   ;;  %s784_s17 = smov %s613_s19 }
  0x57   : > { %p13_p10 = scmp.ge.s32.totalorder %s16_s21, 6   ;;  %s785_s18 = smov %s617_s20 }
  0x58   : > { %s786_s19 = smov %s789_s0  ;;  %s787_s20 = smov %s793_s22 }
  0x59   :  { %15 = sbr.rel (!%p13_p10) target bundleno = 3 (0x3), region = 85 }

</bundles_post_ra>
